<compile_context>
chip_gen: v5e
topology: v5e:2x2
jax: 0.10.0
libtpu: 0.0.40
codegen_flags: <defaults>
</compile_context>

<pallas_src>
import functools

import jax
import jax.numpy as jnp
from jax.experimental import pallas as pl
from jax.experimental.pallas import tpu as pltpu


COMPUTE_DTYPE = jnp.bfloat16   # MXU input dtype (f32 accumulation everywhere)
LANE = 128                     # vreg lane width
SUBLANE_PACK = 16              # bf16 rows per packed sublane group
B_TILE_MAX = 256               # fills the 256-wide MXU on v6e/v7x


def _round_up(x, m):
    return ((x + m - 1) // m) * m


def _detect_vmem_budget():
    """Generation-aware scoped-VMEM budget (bytes), with conservative fallback."""
    cap = 0
    try:
        info = pltpu.get_tpu_info()
        v = getattr(info, "vmem_capacity_bytes", 0)
        if isinstance(v, int) and v > 0:
            cap = v
    except Exception:
        cap = 0
    if cap <= 0:
        cap = 64 << 20                      # conservative: v7x physical VMEM
    if cap <= (64 << 20):                   # v7x-like: leave compiler headroom
        return min(cap * 3 // 4, 48 << 20)
    return min(cap * 4 // 5, 100 << 20)     # v5e / v6e: 128 MiB physical


_VMEM_BUDGET = _detect_vmem_budget()
_K_TILE_MAX = 2048 if _VMEM_BUDGET > (48 << 20) else 1024


# --------------------- fast path: w1 resident, grid=(nb,) ------------------ #

def _train_kernel_fast(x_ref, w1_ref, b1_ref, w2_ref, b2_ref, out_ref):
    feat = jnp.dot(x_ref[...], w1_ref[...], preferred_element_type=jnp.float32)
    feat = jnp.maximum(feat + b1_ref[...], 0.0)                       # ReLU (VPU)
    out_ref[...] = jnp.dot(feat.astype(w2_ref.dtype), w2_ref[...],
                           preferred_element_type=jnp.float32) + b2_ref[...]


def _eval_kernel_fast(x_ref, w1_ref, b1_ref, means2_ref, neg_msq_ref, out_ref):
    feat = jnp.dot(x_ref[...], w1_ref[...], preferred_element_type=jnp.float32)
    feat = jnp.maximum(feat + b1_ref[...], 0.0)
    feat_c = feat.astype(means2_ref.dtype)          # single bf16 cast for both terms
    f_sq = jnp.sum(feat_c.astype(jnp.float32) ** 2, axis=-1, keepdims=True)
    cross2 = jnp.dot(feat_c, means2_ref[...],
                     preferred_element_type=jnp.float32)              # feat @ (2*mu)
    out_ref[...] = cross2 - f_sq + neg_msq_ref[...]


# ---------- K-tiled fallback: grid=(nb, nk), f32 VMEM accumulator ----------- #

def _train_kernel_ktiled(x_ref, w1_ref, b1_ref, w2_ref, b2_ref, out_ref, acc):
    k = pl.program_id(1)
    part = jnp.dot(x_ref[...], w1_ref[...], preferred_element_type=jnp.float32)

    @pl.when(k == 0)
    def _():
        acc[...] = part                      # write, no zero-fill pass

    @pl.when(k != 0)
    def _():
        acc[...] += part

    @pl.when(k == pl.num_programs(1) - 1)
    def _():
        feat = jnp.maximum(acc[...] + b1_ref[...], 0.0)
        out_ref[...] = jnp.dot(feat.astype(w2_ref.dtype), w2_ref[...],
                               preferred_element_type=jnp.float32) + b2_ref[...]


def _eval_kernel_ktiled(x_ref, w1_ref, b1_ref, means2_ref, neg_msq_ref, out_ref, acc):
    k = pl.program_id(1)
    part = jnp.dot(x_ref[...], w1_ref[...], preferred_element_type=jnp.float32)

    @pl.when(k == 0)
    def _():
        acc[...] = part

    @pl.when(k != 0)
    def _():
        acc[...] += part

    @pl.when(k == pl.num_programs(1) - 1)
    def _():
        feat = jnp.maximum(acc[...] + b1_ref[...], 0.0)
        feat_c = feat.astype(means2_ref.dtype)
        f_sq = jnp.sum(feat_c.astype(jnp.float32) ** 2, axis=-1, keepdims=True)
        cross2 = jnp.dot(feat_c, means2_ref[...], preferred_element_type=jnp.float32)
        out_ref[...] = cross2 - f_sq + neg_msq_ref[...]


# ----------------------------- wrapper ------------------------------------- #

def _pad2(a, rows, cols, dtype):
    a = a.astype(dtype)
    pr, pc = rows - a.shape[0], cols - a.shape[1]
    if pr or pc:
        a = jnp.pad(a, ((0, pr), (0, pc)))
    return a


@functools.partial(jax.jit, static_argnames=("training",))
def train_eval_forward(x, params, *, training):
    """Forward pass of TrainEvalModel. `training` selects the classifier."""
    b = x.shape[0]
    k_feat, hidden = params["w1"].shape
    num_classes = params["b2"].shape[-1]

    h_pad = _round_up(hidden, LANE)
    c_pad = _round_up(num_classes, LANE)
    itm = jnp.dtype(COMPUTE_DTYPE).itemsize

    # ---- batch tiling -------------------------------------------------------
    b16 = _round_up(b, SUBLANE_PACK)
    if b16 > B_TILE_MAX:
        tb = B_TILE_MAX                       # big batch: fill the 256-wide MXU
    elif b16 >= 64:
        tb = max(SUBLANE_PACK, _round_up(b16 // 2, SUBLANE_PACK))  # >=2 tiles for v7x megacore
    else:
        tb = b16                              # tiny batch: single tile
    b_pad = _round_up(b, tb)
    nb = b_pad // tb

    # ---- K tiling / fast-path decision (derived from the VMEM budget) -------
    k_full = _round_up(k_feat, LANE)
    fixed_tail = (h_pad * 4                   # b1
                  + 2 * h_pad * c_pad * itm   # w2 / 2*means
                  + c_pad * 4                 # b2 / -m_sq
                  + 2 * tb * c_pad * 4)       # out (double-buffered)
    fast_foot = 2 * k_full * h_pad * itm + 2 * tb * k_full * itm + fixed_tail
    use_fast = fast_foot <= (_VMEM_BUDGET // 2)

    if use_fast:
        tk = k_pad = k_full
        footprint = fast_foot
    else:
        tk = _round_up(min(_K_TILE_MAX, k_full), LANE)
        while tk > LANE:
            foot = (2 * tb * tk * itm + 2 * tk * h_pad * itm
                    + fixed_tail + tb * h_pad * 4)
            if foot <= _VMEM_BUDGET:
                break
            tk -= LANE
        # TODO(synk): if even tk==128 does not fit (very large hidden), an extra
        # hidden-dim tiling axis would be needed; not implemented here.
        k_pad = _round_up(k_feat, tk)
        footprint = (2 * tb * tk * itm + 2 * tk * h_pad * itm
                     + fixed_tail + tb * h_pad * 4)

    # ---- operand prep: single bf16 cast of x, pad to vreg/MXU tiles ---------
    x_p = _pad2(x.reshape(b, -1).astype(COMPUTE_DTYPE), b_pad, k_pad, COMPUTE_DTYPE)
    w1_p = _pad2(params["w1"], k_pad, h_pad, COMPUTE_DTYPE)
    b1_p = _pad2(params["b1"], 1, h_pad, jnp.float32)

    if training:
        mat_p = _pad2(params["w2"], h_pad, c_pad, COMPUTE_DTYPE)
        row_p = _pad2(params["b2"], 1, c_pad, jnp.float32)
    else:
        # NCM: -||f-mu||^2 = (f @ 2*mu) - ||f||^2 - ||mu||^2. All terms use the
        # same bf16-cast operands so the cancellation is numerically consistent.
        # TODO(synk): Avalanche's NCM optionally L2-normalizes features/means;
        # not replicated here (raw negative squared distance).
        means_c = _pad2(params["means_t"], h_pad, c_pad, COMPUTE_DTYPE)
        mat_p = (means_c.astype(jnp.float32) * 2.0).astype(COMPUTE_DTYPE)  # exact x2
        row_p = -jnp.sum(means_c.astype(jnp.float32) ** 2, axis=0, keepdims=True)

    vmem_limit = int(min(_VMEM_BUDGET, max(2 * footprint, 8 << 20)))

    if use_fast:
        in_specs = [
            pl.BlockSpec((tb, k_pad), lambda i: (i, 0)),
            pl.BlockSpec((k_pad, h_pad), lambda i: (0, 0)),   # resident, fetched once
            pl.BlockSpec((1, h_pad), lambda i: (0, 0)),
            pl.BlockSpec((h_pad, c_pad), lambda i: (0, 0)),
            pl.BlockSpec((1, c_pad), lambda i: (0, 0)),
        ]
        out_spec = pl.BlockSpec((tb, c_pad), lambda i: (i, 0))
        grid = (nb,)
        scratch = []
        semantics = ("parallel",)
        kernel = _train_kernel_fast if training else _eval_kernel_fast
    else:
        nk = k_pad // tk
        in_specs = [
            pl.BlockSpec((tb, tk), lambda i, k: (i, k)),
            pl.BlockSpec((tk, h_pad), lambda i, k: (k, 0)),
            pl.BlockSpec((1, h_pad), lambda i, k: (0, 0)),
            pl.BlockSpec((h_pad, c_pad), lambda i, k: (0, 0)),
            pl.BlockSpec((1, c_pad), lambda i, k: (0, 0)),
        ]
        out_spec = pl.BlockSpec((tb, c_pad), lambda i, k: (i, 0))  # resident over k
        grid = (nb, nk)
        scratch = [pltpu.VMEM((tb, h_pad), jnp.float32)]
        semantics = ("parallel", "arbitrary")
        kernel = _train_kernel_ktiled if training else _eval_kernel_ktiled

    out = pl.pallas_call(
        kernel,
        out_shape=jax.ShapeDtypeStruct((b_pad, c_pad), jnp.float32),
        grid_spec=pltpu.PrefetchScalarGridSpec(
            num_scalar_prefetch=0,
            grid=grid,
            in_specs=in_specs,
            out_specs=out_spec,
            scratch_shapes=scratch,
        ),
        compiler_params=pltpu.CompilerParams(
            dimension_semantics=semantics,
            vmem_limit_bytes=vmem_limit,
        ),
    )(x_p, w1_p, b1_p, mat_p, row_p)

    # strip batch / class padding (padded class columns never reach downstream)
    return out[:b, :num_classes]


def init_params(key, in_features, hidden, num_classes):
    k1, k2, k3, k4, k5 = jax.random.split(key, 5)
    scale1 = 1.0 / jnp.sqrt(in_features)
    scale2 = 1.0 / jnp.sqrt(hidden)
    return {
        # feature extractor Linear (stored as [in, out] for x @ W)
        "w1": jax.random.normal(k1, (in_features, hidden), jnp.float32) * scale1,
        "b1": jax.random.normal(k2, (1, hidden), jnp.float32) * scale1,
        # train classifier Linear
        "w2": jax.random.normal(k3, (hidden, num_classes), jnp.float32) * scale2,
        "b2": jax.random.normal(k4, (1, num_classes), jnp.float32) * scale2,
        # eval (NCM) classifier: class means, stored transposed [hidden, classes]
        "means_t": jax.random.normal(k5, (hidden, num_classes), jnp.float32),
    }


# pure-JAX reference (emulating the kernel's bf16-input / f32-accum precision)
def _reference(x, params, training):
    hi = jax.lax.Precision.HIGHEST
    c = lambda a: a.astype(COMPUTE_DTYPE).astype(jnp.float32)
    xf = c(x.reshape(x.shape[0], -1))
    feat = jnp.maximum(jnp.dot(xf, c(params["w1"]), precision=hi) + params["b1"], 0.0)
    if training:
        return jnp.dot(c(feat), c(params["w2"]), precision=hi) + params["b2"]
    fc = c(feat)
    m = c(params["means_t"])
    f_sq = jnp.sum(fc * fc, axis=-1, keepdims=True)
    m_sq = jnp.sum(m * m, axis=0, keepdims=True)
    cross = jnp.dot(fc, m, precision=hi)
    return -(f_sq - 2.0 * cross + m_sq)


# ------------------------------- main -------------------------------------- #

if __name__ == "__main__":
    B, C, H, W = 2, 4, 16, 16
    HIDDEN, NUM_CLASSES = 32, 10

    key = jax.random.PRNGKey(0)
    kx, kp = jax.random.split(key)
    x = jax.random.normal(kx, (B, C, H, W), jnp.float32)   # NCHW
    params = init_params(kp, C * H * W, HIDDEN, NUM_CLASSES)

    # training=True path -> train_classifier
    logits_train = train_eval_forward(x, params, training=True)
    jax.block_until_ready(logits_train)
    assert logits_train.shape == (B, NUM_CLASSES)
    assert bool(jnp.allclose(logits_train, _reference(x, params, True),
                             rtol=2e-2, atol=2e-2))

    # training=False path -> eval_classifier (NCM)
    scores_eval = train_eval_forward(x, params, training=False)
    jax.block_until_ready(scores_eval)
    assert scores_eval.shape == (B, NUM_CLASSES)
    assert bool(jnp.allclose(scores_eval, _reference(x, params, False),
                             rtol=2e-2, atol=2e-2))

    print("KERNEL_OK")
</pallas_src>

<mosaic_0001>
module attributes {stable_mosaic.version = 11 : i64} {
  func.func @_train_kernel_fast(%arg0: i32, %arg1: memref<16x1024xbf16, #tpu.memory_space<vmem>>, %arg2: memref<1024x128xbf16, #tpu.memory_space<vmem>>, %arg3: memref<1x128xf32, #tpu.memory_space<vmem>>, %arg4: memref<128x128xbf16, #tpu.memory_space<vmem>>, %arg5: memref<1x128xf32, #tpu.memory_space<vmem>>, %arg6: memref<16x128xf32, #tpu.memory_space<vmem>>) attributes {dimension_semantics = [#tpu.dimension_semantics<parallel>], iteration_bounds = array<i64: 1>, scalar_prefetch = 0 : i64, scratch_operands = 0 : i64, tpu.core_type = #tpu.core_type<tc>, window_params = [{transform_indices = @transform_0, window_bounds = array<i64: 16, 1024>}, {pipeline_mode = #tpu.pipeline_mode<synchronous>, transform_indices = @transform_1, window_bounds = array<i64: 1024, 128>}, {pipeline_mode = #tpu.pipeline_mode<synchronous>, transform_indices = @transform_2, window_bounds = array<i64: 1, 128>}, {pipeline_mode = #tpu.pipeline_mode<synchronous>, transform_indices = @transform_3, window_bounds = array<i64: 128, 128>}, {pipeline_mode = #tpu.pipeline_mode<synchronous>, transform_indices = @transform_4, window_bounds = array<i64: 1, 128>}, {transform_indices = @transform_5, window_bounds = array<i64: 16, 128>}]} {
    %c0 = arith.constant 0 : index
    %c0_0 = arith.constant 0 : index
    %0 = vector.load %arg1[%c0, %c0_0] : memref<16x1024xbf16, #tpu.memory_space<vmem>>, vector<16x1024xbf16>
    %c0_1 = arith.constant 0 : index
    %c0_2 = arith.constant 0 : index
    %1 = vector.load %arg2[%c0_1, %c0_2] : memref<1024x128xbf16, #tpu.memory_space<vmem>>, vector<1024x128xbf16>
    %cst = arith.constant dense<0.000000e+00> : vector<16x128xf32>
    %2 = tpu.matmul %0, %1, %cst {dimension_numbers = #tpu.dot_dimension_numbers<[1], [0], [0], [1], [0, 0, 1, 1], [], []>} : vector<16x1024xbf16>, vector<1024x128xbf16>, vector<16x128xf32> -> vector<16x128xf32>
    %c0_3 = arith.constant 0 : index
    %c0_4 = arith.constant 0 : index
    %3 = vector.load %arg3[%c0_3, %c0_4] : memref<1x128xf32, #tpu.memory_space<vmem>>, vector<1x128xf32>
    %4 = vector.broadcast %3 : vector<1x128xf32> to vector<16x128xf32>
    %5 = arith.addf %2, %4 : vector<16x128xf32>
    %cst_5 = arith.constant 0.000000e+00 : f32
    %6 = vector.broadcast %cst_5 : f32 to vector<16x128xf32>
    %7 = arith.maximumf %5, %6 : vector<16x128xf32>
    %8 = arith.truncf %7 : vector<16x128xf32> to vector<16x128xbf16>
    %c0_6 = arith.constant 0 : index
    %c0_7 = arith.constant 0 : index
    %9 = vector.load %arg4[%c0_6, %c0_7] : memref<128x128xbf16, #tpu.memory_space<vmem>>, vector<128x128xbf16>
    %cst_8 = arith.constant dense<0.000000e+00> : vector<16x128xf32>
    %10 = tpu.matmul %8, %9, %cst_8 {dimension_numbers = #tpu.dot_dimension_numbers<[1], [0], [0], [1], [0, 0, 1, 1], [], []>} : vector<16x128xbf16>, vector<128x128xbf16>, vector<16x128xf32> -> vector<16x128xf32>
    %c0_9 = arith.constant 0 : index
    %c0_10 = arith.constant 0 : index
    %11 = vector.load %arg5[%c0_9, %c0_10] : memref<1x128xf32, #tpu.memory_space<vmem>>, vector<1x128xf32>
    %12 = vector.broadcast %11 : vector<1x128xf32> to vector<16x128xf32>
    %13 = arith.addf %10, %12 : vector<16x128xf32>
    %c0_11 = arith.constant 0 : index
    %c0_12 = arith.constant 0 : index
    %14 = vector.load %arg6[%c0_11, %c0_12] : memref<16x128xf32, #tpu.memory_space<vmem>>, vector<16x128xf32>
    tpu.vector_store %arg6[%c0_11, %c0_12], %13 {strides = array<i32>} : memref<16x128xf32, #tpu.memory_space<vmem>>, vector<16x128xf32>,
    return
  }
  func.func @transform_0(%arg0: i32) -> (i32, i32) {
    %c0_i32 = arith.constant 0 : i32
    %c0_i32_0 = arith.constant 0 : i32
    return %arg0, %c0_i32 : i32, i32
  }
  func.func @transform_1(%arg0: i32) -> (i32, i32) {
    %c0_i32 = arith.constant 0 : i32
    %c0_i32_0 = arith.constant 0 : i32
    %c0_i32_1 = arith.constant 0 : i32
    return %c0_i32, %c0_i32_0 : i32, i32
  }
  func.func @transform_2(%arg0: i32) -> (i32, i32) {
    %c0_i32 = arith.constant 0 : i32
    %c0_i32_0 = arith.constant 0 : i32
    %c0_i32_1 = arith.constant 0 : i32
    return %c0_i32, %c0_i32_0 : i32, i32
  }
  func.func @transform_3(%arg0: i32) -> (i32, i32) {
    %c0_i32 = arith.constant 0 : i32
    %c0_i32_0 = arith.constant 0 : i32
    %c0_i32_1 = arith.constant 0 : i32
    return %c0_i32, %c0_i32_0 : i32, i32
  }
  func.func @transform_4(%arg0: i32) -> (i32, i32) {
    %c0_i32 = arith.constant 0 : i32
    %c0_i32_0 = arith.constant 0 : i32
    %c0_i32_1 = arith.constant 0 : i32
    return %c0_i32, %c0_i32_0 : i32, i32
  }
  func.func @transform_5(%arg0: i32) -> (i32, i32) {
    %c0_i32 = arith.constant 0 : i32
    %c0_i32_0 = arith.constant 0 : i32
    return %arg0, %c0_i32 : i32, i32
  }
}

</mosaic_0001>

<bundles_post_ra>
// kernel: train_eval_forward.1
= control target key start
LH: loop header
LB: loop body
LE: loop exit
PB: predicated region body
PF: predicated region fallthrough
CT: control target
= control target key end

     0   :  { %s1495_s1 = inlined_call_operand.vmem [shape: bf16[1024,128], index: 1, kind: input, shape index: {}]   ;;  %s1496_s2 = inlined_call_operand.vmem [shape: f32[1,128], index: 2, kind: input, shape index: {}]   ;;  %s1497_s0 = inlined_call_operand.vmem [shape: bf16[16,1024], index: 0, kind: input, shape index: {}]   ;;  %s1498_s4 = inlined_call_operand.vmem [shape: f32[1,128], index: 4, kind: input, shape index: {}]   ;;  %s1499_s3 = inlined_call_operand.vmem [shape: bf16[128,128], index: 3, kind: input, shape index: {}]   ;;  %s1500_s5 = inlined_call_operand.vmem [shape: f32[16,128], index: 5, kind: output, shape index: {}]  }
   0x1   :  { %v1122_v0 = vld [vmem:[%s1495_s1 + $0x38] sm:$0xff]  ;;  %v1121_v4 = vld [vmem:[%s1495_s1 + $0x30] sm:$0xff]  ;;  %v1120_v8 = vld [vmem:[%s1495_s1 + $0x28] sm:$0xff] }
   0x2   :  { %v1130_v1 = vld [vmem:[%s1495_s1 + $0x78] sm:$0xff]  ;;  %584 = vmatpush.bf16.msra.mxu0 %v1122_v0  ;;  %v1129_v5 = vld [vmem:[%s1495_s1 + $0x70] sm:$0xff]  ;;  %v1128_v9 = vld [vmem:[%s1495_s1 + $0x68] sm:$0xff] }
   0x3   :  { %v1138_v2 = vld [vmem:[%s1495_s1 + $0xb8] sm:$0xff]  ;;  %598 = vmatpush.bf16.msra.mxu1 %v1130_v1  ;;  %v1137_v6 = vld [vmem:[%s1495_s1 + $0xb0] sm:$0xff]  ;;  %v1136_v10 = vld [vmem:[%s1495_s1 + $0xa8] sm:$0xff] }
   0x4   :  { %v1146_v3 = vld [vmem:[%s1495_s1 + $0xf8] sm:$0xff]  ;;  %612 = vmatpush.bf16.msra.mxu2 %v1138_v2  ;;  %v1145_v7 = vld [vmem:[%s1495_s1 + $0xf0] sm:$0xff]  ;;  %v1144_v11 = vld [vmem:[%s1495_s1 + $0xe8] sm:$0xff] }
   0x5   :  { %626 = vmatpush.bf16.msra.mxu3 %v1146_v3  ;;  %v1119_v12 = vld [vmem:[%s1495_s1 + $0x20] sm:$0xff]  ;;  %v1118_v16 = vld [vmem:[%s1495_s1 + $0x18] sm:$0xff]  ;;  %v1117_v20 = vld [vmem:[%s1495_s1 + $0x10] sm:$0xff] }
   0x6   :  { %585 = vmatpush.bf16.msra.mxu0 %v1121_v4  ;;  %v1127_v13 = vld [vmem:[%s1495_s1 + $0x60] sm:$0xff]  ;;  %v1126_v17 = vld [vmem:[%s1495_s1 + $0x58] sm:$0xff]  ;;  %v1125_v21 = vld [vmem:[%s1495_s1 + $0x50] sm:$0xff] }
   0x7   :  { %599 = vmatpush.bf16.msra.mxu1 %v1129_v5  ;;  %v1135_v14 = vld [vmem:[%s1495_s1 + $0xa0] sm:$0xff]  ;;  %v1134_v18 = vld [vmem:[%s1495_s1 + $0x98] sm:$0xff]  ;;  %v1133_v22 = vld [vmem:[%s1495_s1 + $0x90] sm:$0xff] }
   0x8   :  { %613 = vmatpush.bf16.msra.mxu2 %v1137_v6  ;;  %v1143_v15 = vld [vmem:[%s1495_s1 + $0xe0] sm:$0xff]  ;;  %v1142_v19 = vld [vmem:[%s1495_s1 + $0xd8] sm:$0xff]  ;;  %v1141_v23 = vld [vmem:[%s1495_s1 + $0xd0] sm:$0xff] }
   0x9   :  { %627 = vmatpush.bf16.msra.mxu3 %v1145_v7  ;;  %v1116_v24 = vld [vmem:[%s1495_s1 + $0x8] sm:$0xff]  ;;  %v1115_v28 = vld [vmem:[%s1495_s1] sm:$0xff]  ;;  %v1154_v32 = vld [vmem:[%s1495_s1 + $0x138] sm:$0xff] }
   0xa   :  { %586 = vmatpush.bf16.msra.mxu0 %v1120_v8  ;;  %v1124_v25 = vld [vmem:[%s1495_s1 + $0x48] sm:$0xff]  ;;  %v1123_v29 = vld [vmem:[%s1495_s1 + $0x40] sm:$0xff]  ;;  %v1162_v33 = vld [vmem:[%s1495_s1 + $0x178] sm:$0xff] }
   0xb   :  { %600 = vmatpush.bf16.msra.mxu1 %v1128_v9  ;;  %v1132_v26 = vld [vmem:[%s1495_s1 + $0x88] sm:$0xff]  ;;  %v1131_v30 = vld [vmem:[%s1495_s1 + $0x80] sm:$0xff]  ;;  %v1170_v42 = vld [vmem:[%s1495_s1 + $0x1b8] sm:$0xff] }
   0xc   :  { %614 = vmatpush.bf16.msra.mxu2 %v1136_v10  ;;  %v1140_v27 = vld [vmem:[%s1495_s1 + $0xc8] sm:$0xff]  ;;  %v1139_v31 = vld [vmem:[%s1495_s1 + $0xc0] sm:$0xff]  ;;  %v1178_v43 = vld [vmem:[%s1495_s1 + $0x1f8] sm:$0xff] }
   0xd   :  { %628 = vmatpush.bf16.msra.mxu3 %v1144_v11  ;;  %v797_v34 = vld [vmem:[%s1497_s0 + $0x8] sm:$0xf]  ;;  %v789_v36 = vld [vmem:[%s1497_s0] sm:$0xf]  ;;  %v1108_v38 = vld [vmem:[%s1497_s0 + $0xc] sm:$0xf] }
   0xe   :  { %587 = vmatpush.bf16.msra.mxu0 %v1119_v12  ;;  %v1112_v35 = vld [vmem:[%s1497_s0 + $0x24] sm:$0xf0]  ;;  %v1111_v37 = vld [vmem:[%s1497_s0 + $0x1c] sm:$0xf0]  ;;  %v799_v39 = vld [vmem:[%s1497_s0 + $0x28] sm:$0xf0] }
   0xf   :  { %601 = vmatpush.bf16.msra.mxu1 %v1127_v13  ;;  %v1107_v40 = vld [vmem:[%s1497_s0 + $0x4] sm:$0xf]  ;;  %v798_v44 = vor.u32 %v1112_v35, %v797_v34  ;;  %v790_v45 = vor.u32 %v1111_v37, %v789_v36  ;;  %v802_v46 = vor.u32 %v1108_v38, %v799_v39  ;;  %v1153_v48 = vld [vmem:[%s1495_s1 + $0x130] sm:$0xff]  ;;  %v1152_v52 = vld [vmem:[%s1495_s1 + $0x128] sm:$0xff] }
  0x10   :  { %615 = vmatpush.bf16.msra.mxu2 %v1135_v14  ;;  %v791_v41 = vld [vmem:[%s1497_s0 + $0x20] sm:$0xf0]  ;;  %v1161_v49 = vld [vmem:[%s1495_s1 + $0x170] sm:$0xff]  ;;  %v1160_v53 = vld [vmem:[%s1495_s1 + $0x168] sm:$0xff] }
  0x11   :  { %629 = vmatpush.bf16.msra.mxu3 %v1143_v15  ;;  %v794_v47 = vor.u32 %v1107_v40, %v791_v41  ;;  %v1169_v50 = vld [vmem:[%s1495_s1 + $0x1b0] sm:$0xff]  ;;  %v1168_v54 = vld [vmem:[%s1495_s1 + $0x1a8] sm:$0xff]  ;;  %v1151_v56 = vld [vmem:[%s1495_s1 + $0x120] sm:$0xff] }
  0x12   :  { %588 = vmatpush.bf16.msra.mxu0 %v1118_v16  ;;  %v1177_v51 = vld [vmem:[%s1495_s1 + $0x1f0] sm:$0xff]  ;;  %v1176_v55 = vld [vmem:[%s1495_s1 + $0x1e8] sm:$0xff]  ;;  %v1159_v57 = vld [vmem:[%s1495_s1 + $0x160] sm:$0xff] }
  0x13   :  { %602 = vmatpush.bf16.msra.mxu1 %v1126_v17  ;;  %v1167_v58 = vld [vmem:[%s1495_s1 + $0x1a0] sm:$0xff]  ;;  %v1150_v60 = vld [vmem:[%s1495_s1 + $0x118] sm:$0xff]  ;;  %v1149_v0 = vld [vmem:[%s1495_s1 + $0x110] sm:$0xff] }
  0x14   :  { %616 = vmatpush.bf16.msra.mxu2 %v1134_v18  ;;  %v1175_v59 = vld [vmem:[%s1495_s1 + $0x1e0] sm:$0xff]  ;;  %v1158_v61 = vld [vmem:[%s1495_s1 + $0x158] sm:$0xff]  ;;  %v1157_v1 = vld [vmem:[%s1495_s1 + $0x150] sm:$0xff] }
  0x15   :  { %630 = vmatpush.bf16.msra.mxu3 %v1142_v19  ;;  %v1166_v62 = vld [vmem:[%s1495_s1 + $0x198] sm:$0xff]  ;;  %v1165_v2 = vld [vmem:[%s1495_s1 + $0x190] sm:$0xff]  ;;  %v1148_v4 = vld [vmem:[%s1495_s1 + $0x108] sm:$0xff] }
  0x16   :  { %589 = vmatpush.bf16.msra.mxu0 %v1117_v20  ;;  %v1174_v63 = vld [vmem:[%s1495_s1 + $0x1d8] sm:$0xff]  ;;  %v1173_v3 = vld [vmem:[%s1495_s1 + $0x1d0] sm:$0xff]  ;;  %v1156_v5 = vld [vmem:[%s1495_s1 + $0x148] sm:$0xff] }
  0x17   :  { %603 = vmatpush.bf16.msra.mxu1 %v1125_v21  ;;  %v1164_v6 = vld [vmem:[%s1495_s1 + $0x188] sm:$0xff]  ;;  %v1147_v8 = vld [vmem:[%s1495_s1 + $0x100] sm:$0xff]  ;;  %v805_v12 = vld [vmem:[%s1497_s0 + $0x10] sm:$0xf] }
  0x18   :  { %617 = vmatpush.bf16.msra.mxu2 %v1133_v22  ;;  %v1172_v7 = vld [vmem:[%s1495_s1 + $0x1c8] sm:$0xff]  ;;  %v1155_v9 = vld [vmem:[%s1495_s1 + $0x140] sm:$0xff]  ;;  %v1113_v13 = vld [vmem:[%s1497_s0 + $0x2c] sm:$0xf0] }
  0x19   :  { %631 = vmatpush.bf16.msra.mxu3 %v1141_v23  ;;  %v1163_v10 = vld [vmem:[%s1495_s1 + $0x180] sm:$0xff]  ;;  %v1109_v14 = vld [vmem:[%s1497_s0 + $0x14] sm:$0xf]  ;;  %v813_v16 = vld [vmem:[%s1497_s0 + $0x18] sm:$0xf]  ;;  %v806_v20 = vor.u32 %v1113_v13, %v805_v12 }
  0x1a   :  { %590 = vmatpush.bf16.msra.mxu0 %v1116_v24  ;;  %v1171_v11 = vld [vmem:[%s1495_s1 + $0x1c0] sm:$0xff]  ;;  %v807_v15 = vld [vmem:[%s1497_s0 + $0x30] sm:$0xf0]  ;;  %v1114_v17 = vld [vmem:[%s1497_s0 + $0x34] sm:$0xf0] }
  0x1b   :  { %604 = vmatpush.bf16.msra.mxu1 %v1124_v25  ;;  %v1110_v18 = vld [vmem:[%s1497_s0 + $0x1c] sm:$0xf]  ;;  %v810_v21 = vor.u32 %v1109_v14, %v807_v15  ;;  %v814_v22 = vor.u32 %v1114_v17, %v813_v16  ;;  %v1185_v25 = vld [vmem:[%s1499_s3 + $0x30] sm:$0xff]  ;;  %v1187_v34 = vld [vmem:[%s1496_s2] ss:$0 sm:$0xff] }
  0x1c   :  { %618 = vmatpush.bf16.msra.mxu2 %v1132_v26  ;;  %v815_v19 = vld [vmem:[%s1497_s0 + $0x38] sm:$0xf0]  ;;  %v1184_v26 = vld [vmem:[%s1499_s3 + $0x28] sm:$0xff] }
  0x1d   :  { %632 = vmatpush.bf16.msra.mxu3 %v1140_v27  ;;  %v818_v23 = vor.u32 %v1110_v18, %v815_v19  ;;  %v1186_v24 = vld [vmem:[%s1499_s3 + $0x38] sm:$0xff]  ;;  %v1183_v27 = vld [vmem:[%s1499_s3 + $0x20] sm:$0xff] }
  0x1e   :  { %591 = vmatpush.bf16.msra.mxu0 %v1115_v28  ;;  %v1182_v28 = vld [vmem:[%s1499_s3 + $0x18] sm:$0xff] }
  0x1f   :  { %605 = vmatpush.bf16.msra.mxu1 %v1123_v29  ;;  %v1181_v29 = vld [vmem:[%s1499_s3 + $0x10] sm:$0xff] }
  0x20   :  { %619 = vmatpush.bf16.msra.mxu2 %v1131_v30 }
  0x21   :  { %633 = vmatpush.bf16.msra.mxu3 %v1139_v31  ;;  %592 = vmatmul.bf16.vlgmr.msra.gmra.mxu0 %v790_v45  ;;  %v1180_v31 = vld [vmem:[%s1499_s3 + $0x8] sm:$0xff] }
  0x22   :  { %640 = vmatpush.bf16.msrb.mxu0 %v1154_v32  ;;  %606 = vmatmul.bf16.vlgmr.msra.gmra.mxu1 %v794_v47 }
  0x23   :  { %654 = vmatpush.bf16.msrb.mxu1 %v1162_v33  ;;  %620 = vmatmul.bf16.vlgmr.msra.gmra.mxu2 %v798_v44  ;;  %v1179_v33 = vld [vmem:[%s1499_s3] sm:$0xff] }
  0x24   :  { %668 = vmatpush.bf16.msrb.mxu2 %v1170_v42  ;;  %634 = vmatmul.bf16.vlgmr.msra.gmra.mxu3 %v802_v46 }
  0x25   :  { %682 = vmatpush.bf16.msrb.mxu3 %v1178_v43 }
  0x26   :  { %641 = vmatpush.bf16.msrb.mxu0 %v1153_v48 }
  0x27   :  { %655 = vmatpush.bf16.msrb.mxu1 %v1161_v49 }
  0x28   :  { %669 = vmatpush.bf16.msrb.mxu2 %v1169_v50 }
  0x29   :  { %683 = vmatpush.bf16.msrb.mxu3 %v1177_v51 }
  0x2a   :  { %642 = vmatpush.bf16.msrb.mxu0 %v1152_v52 }
  0x2b   :  { %656 = vmatpush.bf16.msrb.mxu1 %v1160_v53 }
  0x2c   :  { %670 = vmatpush.bf16.msrb.mxu2 %v1168_v54 }
  0x2d   :  { %684 = vmatpush.bf16.msrb.mxu3 %v1176_v55 }
  0x2e   :  { %643 = vmatpush.bf16.msrb.mxu0 %v1151_v56 }
  0x2f   :  { %657 = vmatpush.bf16.msrb.mxu1 %v1159_v57 }
  0x30   :  { %671 = vmatpush.bf16.msrb.mxu2 %v1167_v58 }
  0x31   :  { %685 = vmatpush.bf16.msrb.mxu3 %v1175_v59 }
  0x32   :  { %644 = vmatpush.bf16.msrb.mxu0 %v1150_v60 }
  0x33   :  { %658 = vmatpush.bf16.msrb.mxu1 %v1158_v61 }
  0x34   :  { %672 = vmatpush.bf16.msrb.mxu2 %v1166_v62 }
  0x35   :  { %686 = vmatpush.bf16.msrb.mxu3 %v1174_v63 }
  0x36   :  { %645 = vmatpush.bf16.msrb.mxu0 %v1149_v0 }
  0x37   :  { %659 = vmatpush.bf16.msrb.mxu1 %v1157_v1 }
  0x38   :  { %673 = vmatpush.bf16.msrb.mxu2 %v1165_v2 }
  0x39   :  { %687 = vmatpush.bf16.msrb.mxu3 %v1173_v3 }
  0x3a   :  { %646 = vmatpush.bf16.msrb.mxu0 %v1148_v4  ;;  %v1188_v4 = vld [vmem:[%s1498_s4] ss:$0 sm:$0xff] }
  0x3b   :  { %660 = vmatpush.bf16.msrb.mxu1 %v1156_v5 }
  0x3c   :  { %674 = vmatpush.bf16.msrb.mxu2 %v1164_v6 }
  0x3d   :  { %688 = vmatpush.bf16.msrb.mxu3 %v1172_v7 }
  0x3e   :  { %647 = vmatpush.bf16.msrb.mxu0 %v1147_v8 }
  0x3f   :  { %661 = vmatpush.bf16.msrb.mxu1 %v1155_v9 }
  0x40   :  { %675 = vmatpush.bf16.msrb.mxu2 %v1163_v10 }
  0x41   :  { %689 = vmatpush.bf16.msrb.mxu3 %v1171_v11  ;;  %648 = vmatmul.bf16.vlgmr.msrb.gmra.mxu0 %v806_v20 }
  0x42   :  { %662 = vmatmul.bf16.vlgmr.msrb.gmra.mxu1 %v810_v21  ;;  %767 = vmatpush.bf16.msra.mxu0 %v1186_v24 }
  0x43   :  { %676 = vmatmul.bf16.vlgmr.msrb.gmra.mxu2 %v814_v22 }
  0x44   :  { %690 = vmatmul.bf16.vlgmr.msrb.gmra.mxu3 %v818_v23 }
  0x46   :  { %768 = vmatpush.bf16.msra.mxu0 %v1185_v25 }
  0x4a   :  { %769 = vmatpush.bf16.msra.mxu0 %v1184_v26 }
  0x4e   :  { %770 = vmatpush.bf16.msra.mxu0 %v1183_v27 }
  0x52   :  { %771 = vmatpush.bf16.msra.mxu0 %v1182_v28 }
  0x56   :  { %772 = vmatpush.bf16.msra.mxu0 %v1181_v29 }
  0x5a   :  { %773 = vmatpush.bf16.msra.mxu0 %v1180_v31 }
  0x5e   :  { %774 = vmatpush.bf16.msra.mxu0 %v1179_v33 }
  0x9e   :  { %v593_v30 = vpop.f32.mrf.mxu0 }
  0x9f   :  { %v607_v32 = vpop.f32.mrf.mxu1  ;;  %v594_v37 = vadd.f32 %v1187_v34, %v593_v30 }
  0xa1   :  { %v608_v40 = vadd.f32 %v607_v32, %v594_v37 }
  0xa6   :  { %v621_v35 = vpop.f32.mrf.mxu2  ;;  %v595_v38 = vpop.f32.mrf.mxu0 }
  0xa7   :  { %v635_v36 = vpop.f32.mrf.mxu3  ;;  %v609_v39 = vpop.f32.mrf.mxu1  ;;  %v596_v41 = vadd.f32 %v1187_v34, %v595_v38  ;;  %v622_v44 = vadd.f32 %v621_v35, %v608_v40 }
  0xa9   :  { %v610_v45 = vadd.f32 %v609_v39, %v596_v41  ;;  %v636_v48 = vadd.f32 %v635_v36, %v622_v44 }
  0xae   :  { %v623_v42 = vpop.f32.mrf.mxu2 }
  0xaf   :  { %v637_v43 = vpop.f32.mrf.mxu3  ;;  %v624_v49 = vadd.f32 %v623_v42, %v610_v45 }
  0xb1   :  { %v638_v53 = vadd.f32 %v637_v43, %v624_v49 }
  0xbe   :  { %v649_v46 = vpop.f32.mrf.mxu0 }
  0xbf   :  { %v663_v47 = vpop.f32.mrf.mxu1  ;;  %v650_v50 = vadd.f32 %v649_v46, %v636_v48 }
  0xc1   :  { %v664_v55 = vadd.f32 %v663_v47, %v650_v50 }
  0xc6   :  { %v677_v51 = vpop.f32.mrf.mxu2  ;;  %v651_v54 = vpop.f32.mrf.mxu0 }
  0xc7   :  { %v691_v52 = vpop.f32.mrf.mxu3  ;;  %v652_v56 = vadd.f32 %v651_v54, %v638_v53  ;;  %v678_v57 = vadd.f32 %v677_v51, %v664_v55  ;;  %v665_v58 = vpop.f32.mrf.mxu1 }
  0xc9   :  { %v666_v59 = vadd.f32 %v665_v58, %v652_v56  ;;  %v692_v61 = vadd.f32 %v691_v52, %v678_v57 }
  0xcb   :  { %v696_v1 = vmax.f32 %v692_v61, 0.0 }
  0xce   :  { %v679_v60 = vpop.f32.mrf.mxu2 }
  0xcf   :  { %v680_v62 = vadd.f32 %v679_v60, %v666_v59  ;;  %v693_v63 = vpop.f32.mrf.mxu3 }
  0xd1   :  { %v694_v0 = vadd.f32 %v693_v63, %v680_v62 }
  0xd3   :  { %v697_v2 = vmax.f32 %v694_v0, 0.0 }
  0xd5   :  { %v698_v3 = vpack.c.bf16 %v697_v2, %v696_v1 }
  0xd7   :  { %775 = vmatmul.bf16.vlgmr.msra.gmra.mxu0 %v698_v3 }
 0x154   :  { %v776_v5 = vpop.f32.mrf.mxu0 }
 0x155   :  { %v777_v6 = vadd.f32 %v1188_v4, %v776_v5 }
 0x157   :  { %781 = vst [vmem:[%s1500_s5] sm:$0xff] %v777_v6 }
 0x15c   :  { %v778_v7 = vpop.f32.mrf.mxu0 }
 0x15d   :  { %v779_v8 = vadd.f32 %v1188_v4, %v778_v7 }
 0x15f   :  { %782 = vst [vmem:[%s1500_s5 + $0x8] sm:$0xff] %v779_v8 }

</bundles_post_ra>
